<compile_context>
chip_gen: v5e
topology: v5e:2x2
jax: 0.10.0
libtpu: 0.0.40
codegen_flags: <defaults>
</compile_context>

<pallas_src>
import functools

import jax
import jax.numpy as jnp
import numpy as np
from jax.experimental import pallas as pl
from jax.experimental.pallas import tpu as pltpu


def _pair(v):
    return v if isinstance(v, tuple) else (v, v)


def _tpu_vmem_plan():
    """Return (target_block_bytes, vmem_limit_bytes) sized per TPU generation."""
    cap = None
    try:
        info = pltpu.get_tpu_info()
        for name in ("vmem_capacity_bytes", "vmem_bytes", "vmem_capacity"):
            v = getattr(info, name, None)
            if v:
                cap = int(v)
                break
    except Exception:
        cap = None
    if cap is None:
        return 4 * 1024 * 1024, 40 * 1024 * 1024            # unknown: conservative
    if cap >= 96 * 1024 * 1024:                              # v5e / v6e: 128 MiB VMEM
        return 12 * 1024 * 1024, 80 * 1024 * 1024
    return 5 * 1024 * 1024, 44 * 1024 * 1024                 # v7x-class: 64 MiB / TC


def _choose_tm(n_rows, in_row_bytes, vmem_row_bytes, target_block_bytes,
               vmem_limit_bytes, sublane_tiled):
    """Rows (B*C) per grid step.

    Big enough to amortize the ~0.35us per-step overhead and keep the HBM pipe
    full; small enough that double-buffered in/out blocks plus the in-kernel
    f32 temporaries stay under the scoped-VMEM limit; and capped so that, when
    there is enough work, the "parallel" row axis has several grid steps
    (>= 2-3 per TensorCore on v7x) so prefetch can overlap DMA with compute.
    """
    tm = max(1, target_block_bytes // max(int(in_row_bytes), 1))
    # leave ~25% VMEM headroom for compiler scratch / semaphores
    tm = min(tm, max(1, (3 * vmem_limit_bytes // 4) // max(int(vmem_row_bytes), 1)))
    if n_rows >= 48:
        tm = min(tm, n_rows // 6)
    elif n_rows >= 24:
        tm = min(tm, n_rows // 3)
    elif n_rows >= 16:
        tm = min(tm, n_rows // 2)
    tm = max(1, min(tm, n_rows))
    if sublane_tiled:
        # TM is the second-minor dim of the (K, TM, L) block: it must be a
        # multiple of 8, or exactly equal the full row count.
        if tm >= n_rows or n_rows <= 8:
            tm = n_rows
        else:
            tm = max(8, (tm // 8) * 8)
    return int(min(tm, 4096))


def _std_pool_direct_kernel(x_ref, o_ref, *, kH, kW, dh, dw, oh, ow,
                            unbiased, return_sqrt):
    """Stride-1 pooling, im2col-free, single-pass moments.

    x_ref: (TM, Hp, Wp) zero-padded input rows (one HBM read of the input).
    o_ref: (TM, oh, ow) pooled output.
    The kHxkW shifted windows are static VMEM slices: one lane-offset slice per
    kw (hoisted over kh), then sublane slices per kh.  Reduction over window
    elements is plain VPU adds/muls on full (oh, ow) tiles, accumulated in f32.
    """
    n = kH * kW
    s = None
    ss = None
    for kw in range(kW):
        # One lane-offset slice and one f32 cast per kw (hoisted over kh).
        col = x_ref[:, :, pl.ds(kw * dw, ow)].astype(jnp.float32)   # (TM, Hp, ow)
        for kh in range(kH):
            h0 = kh * dh
            w = col[:, h0:h0 + oh, :]                               # sublane slice
            sq = w * w
            if s is None:
                s, ss = w, sq
            else:
                s = s + w
                ss = ss + sq
    mean = s * (1.0 / n)
    # Guard: unbiased with a 1x1 window would divide by zero; fall back to /n.
    denom = float(n - 1) if (unbiased and n > 1) else float(n)
    var = (ss - s * mean) * (1.0 / denom)
    var = jnp.maximum(var, 0.0)      # one-pass cancellation guard before sqrt
    out = jnp.sqrt(var) if return_sqrt else var
    o_ref[...] = out.astype(o_ref.dtype)


def _std_pool_unfold_kernel(w_ref, o_ref, *, K, unbiased, return_sqrt):
    """General stride/dilation (and small-spatial) path, single-pass moments.

    w_ref: (K, TM, L) windows with K as the *leading* axis, so the reduction is
           full-vreg VPU work on lane-dense (TM, L) tiles (L = oh*ow).
    o_ref: (TM, L) pooled output (lane-dense, unmasked stores).
    """
    w0 = w_ref[0].astype(jnp.float32)
    s = w0
    ss = w0 * w0
    for kk in range(1, K):
        w = w_ref[kk].astype(jnp.float32)
        s = s + w
        ss = ss + w * w
    mean = s * (1.0 / K)
    denom = float(K - 1) if (unbiased and K > 1) else float(K)
    var = (ss - s * mean) * (1.0 / denom)
    var = jnp.maximum(var, 0.0)      # one-pass cancellation guard before sqrt
    out = jnp.sqrt(var) if return_sqrt else var
    o_ref[...] = out.astype(o_ref.dtype)


def std_pool2d(x, k, s=None, p=0, d=1, return_sqrt=True, unbiased=True):
    """Pallas implementation of StdPool2d.forward.  x: (B, C, H, W)."""
    k = _pair(k)
    s = _pair(s) if s is not None else k
    p = _pair(p)
    d = _pair(d)
    kH, kW = k
    sH, sW = s
    pH, pW = p
    dH, dW = d

    B, C, H, W = x.shape
    oh = (H + 2 * pH - dH * (kH - 1) - 1) // sH + 1
    ow = (W + 2 * pW - dW * (kW - 1) - 1) // sW + 1
    K = kH * kW
    L = oh * ow
    N = B * C
    itemsize = jnp.dtype(x.dtype).itemsize
    Hp, Wp = H + 2 * pH, W + 2 * pW

    target_block_bytes, vmem_limit_bytes = _tpu_vmem_plan()
    cparams = pltpu.CompilerParams(
        dimension_semantics=("parallel",),
        vmem_limit_bytes=vmem_limit_bytes,
    )

    x2 = x.reshape(N, H, W)
    x2p = jnp.pad(x2, ((0, 0), (pH, pH), (pW, pW))) if (pH or pW) else x2

    # Dispatch.  The direct kernel reads the padded input exactly once from HBM
    # and slices the kHxkW windows in VMEM, but its compute/store lane axis is
    # ow.  Use it when ow is lane-dense enough, or when the (K, N, L) windows
    # array of the unfold path would blow up HBM traffic.  Everything else
    # (small-spatial stride-1, and general stride/dilation) takes the unfold
    # kernel, whose lane axis is the dense L = oh*ow.
    direct_ok = (sH == 1 and sW == 1)
    windows_bytes = K * N * L * itemsize
    use_direct = direct_ok and (ow >= 96 or windows_bytes > 256 * 1024 * 1024)
    # TODO(synk): overlapping strided windows (1 < s < k) still pay the K-fold
    # windows blow-up; in-kernel lane-strided slices would remove it.

    if use_direct:
        in_row = Hp * Wp * itemsize
        out_row = L * itemsize
        # double-buffered in/out blocks + f32 temporaries (col, s, ss, w, sq)
        vmem_row = 2 * in_row + 2 * out_row + 4 * (Hp * ow + 4 * L)
        tm = _choose_tm(N, in_row, vmem_row, target_block_bytes,
                        vmem_limit_bytes, sublane_tiled=False)
        grid = (pl.cdiv(N, tm),)
        kernel = functools.partial(
            _std_pool_direct_kernel, kH=kH, kW=kW, dh=dH, dw=dW, oh=oh, ow=ow,
            unbiased=unbiased, return_sqrt=return_sqrt)
        out = pl.pallas_call(
            kernel,
            out_shape=jax.ShapeDtypeStruct((N, oh, ow), x.dtype),
            grid_spec=pltpu.PrefetchScalarGridSpec(
                num_scalar_prefetch=0,
                grid=grid,
                in_specs=[pl.BlockSpec((tm, Hp, Wp), lambda i: (i, 0, 0))],
                out_specs=pl.BlockSpec((tm, oh, ow), lambda i: (i, 0, 0)),
            ),
            compiler_params=cparams,
        )(x2p)
        return out.reshape(B, C, oh, ow)

    # Unfold path: build the windows directly in the final (K, N, L) layout
    # (single strided-slice pass; leading K keeps the reduction off the
    # sublane axis and the lane axis fully dense).
    pats = []
    for kh in range(kH):
        for kw in range(kW):
            h0, w0 = kh * dH, kw * dW
            sl = x2p[:, h0:h0 + (oh - 1) * sH + 1:sH,
                        w0:w0 + (ow - 1) * sW + 1:sW]        # (N, oh, ow)
            pats.append(sl.reshape(N, L))
    windows = jnp.stack(pats, axis=0)                        # (K, N, L)

    in_row = K * L * itemsize
    out_row = L * itemsize
    vmem_row = 2 * in_row + 2 * out_row + 4 * 4 * L          # + f32 temporaries
    tm = _choose_tm(N, in_row, vmem_row, target_block_bytes,
                    vmem_limit_bytes, sublane_tiled=True)
    grid = (pl.cdiv(N, tm),)
    kernel = functools.partial(
        _std_pool_unfold_kernel, K=K, unbiased=unbiased, return_sqrt=return_sqrt)
    # (On v7x a pipeline_mode=pl.Buffered(3) sweep on the input spec may help;
    #  kept at the default double-buffering here for portability.)
    out = pl.pallas_call(
        kernel,
        out_shape=jax.ShapeDtypeStruct((N, L), x.dtype),
        grid_spec=pltpu.PrefetchScalarGridSpec(
            num_scalar_prefetch=0,
            grid=grid,
            in_specs=[pl.BlockSpec((K, tm, L), lambda i: (0, i, 0))],
            out_specs=pl.BlockSpec((tm, L), lambda i: (i, 0)),
        ),
        compiler_params=cparams,
    )(windows)
    return out.reshape(B, C, oh, ow)


def _reference(x, k, s=None, p=0, d=1, return_sqrt=True, unbiased=True):
    """Pure-JAX reference mirroring the PyTorch forward."""
    k = _pair(k)
    s = _pair(s) if s is not None else k
    p = _pair(p)
    d = _pair(d)
    B, C, H, W = x.shape
    oh = (H + 2 * p[0] - d[0] * (k[0] - 1) - 1) // s[0] + 1
    ow = (W + 2 * p[1] - d[1] * (k[1] - 1) - 1) // s[1] + 1
    xp = jnp.pad(x, ((0, 0), (0, 0), (p[0], p[0]), (p[1], p[1])))
    pats = []
    for kh in range(k[0]):
        for kw in range(k[1]):
            h0, w0 = kh * d[0], kw * d[1]
            pats.append(xp[:, :, h0:h0 + (oh - 1) * s[0] + 1:s[0],
                               w0:w0 + (ow - 1) * s[1] + 1:s[1]])
    wins = jnp.stack(pats, axis=2).astype(jnp.float32)       # (B, C, K, oh, ow)
    ddof = 1 if (unbiased and k[0] * k[1] > 1) else 0
    var = jnp.var(wins, axis=2, ddof=ddof)
    res = jnp.sqrt(var) if return_sqrt else var
    return res.astype(x.dtype)


if __name__ == "__main__":
    key = jax.random.PRNGKey(0)
    k_small, k_big = jax.random.split(key)
    x = jax.random.normal(k_small, (2, 4, 16, 16), dtype=jnp.float32)

    # Case 1: k=2, s=2, p=0  (non-overlapping -> lane-dense unfold kernel)
    out1 = jax.block_until_ready(std_pool2d(x, k=2, s=2, p=0))
    ref1 = _reference(x, k=2, s=2, p=0)
    assert out1.shape == (2, 4, 8, 8), out1.shape
    np.testing.assert_allclose(np.asarray(out1), np.asarray(ref1), rtol=1e-4, atol=1e-5)

    # Case 2: k=3, s=1, p=1  (small spatial, stride 1 -> lane-dense unfold kernel)
    out2 = jax.block_until_ready(std_pool2d(x, k=3, s=1, p=1))
    ref2 = _reference(x, k=3, s=1, p=1)
    assert out2.shape == (2, 4, 16, 16), out2.shape
    np.testing.assert_allclose(np.asarray(out2), np.asarray(ref2), rtol=1e-4, atol=1e-5)

    # Case 3: variance (return_sqrt=False), biased estimator
    out3 = jax.block_until_ready(std_pool2d(x, k=2, s=2, return_sqrt=False, unbiased=False))
    ref3 = _reference(x, k=2, s=2, return_sqrt=False, unbiased=False)
    np.testing.assert_allclose(np.asarray(out3), np.asarray(ref3), rtol=1e-4, atol=1e-5)

    # Case 4: dilated, stride 1
    out4 = jax.block_until_ready(std_pool2d(x, k=2, s=1, p=0, d=2))
    ref4 = _reference(x, k=2, s=1, p=0, d=2)
    assert out4.shape == (2, 4, 14, 14), out4.shape
    np.testing.assert_allclose(np.asarray(out4), np.asarray(ref4), rtol=1e-4, atol=1e-5)

    # Case 5: lane-dense spatial (ow=128), stride 1 -> direct im2col-free kernel
    x5 = jax.random.normal(k_big, (1, 2, 96, 128), dtype=jnp.float32)
    out5 = jax.block_until_ready(std_pool2d(x5, k=3, s=1, p=1))
    ref5 = _reference(x5, k=3, s=1, p=1)
    assert out5.shape == (1, 2, 96, 128), out5.shape
    np.testing.assert_allclose(np.asarray(out5), np.asarray(ref5), rtol=1e-4, atol=1e-5)

    print("KERNEL_OK")
</pallas_src>

<mosaic_0001>
module attributes {stable_mosaic.version = 11 : i64} {
  func.func @_std_pool_unfold_kernel(%arg0: i32, %arg1: memref<4x8x64xf32, #tpu.memory_space<vmem>>, %arg2: memref<8x64xf32, #tpu.memory_space<vmem>>) attributes {dimension_semantics = [#tpu.dimension_semantics<parallel>], iteration_bounds = array<i64: 1>, scalar_prefetch = 0 : i64, scratch_operands = 0 : i64, tpu.core_type = #tpu.core_type<tc>, window_params = [{transform_indices = @transform_0, window_bounds = array<i64: 4, 8, 64>}, {transform_indices = @transform_1, window_bounds = array<i64: 8, 64>}]} {
    %c0 = arith.constant 0 : index
    %c0_0 = arith.constant 0 : index
    %c0_1 = arith.constant 0 : index
    %0 = vector.load %arg1[%c0, %c0_0, %c0_1] : memref<4x8x64xf32, #tpu.memory_space<vmem>>, vector<1x8x64xf32>
    %1 = vector.shape_cast %0 : vector<1x8x64xf32> to vector<8x64xf32>
    %2 = arith.mulf %1, %1 : vector<8x64xf32>
    %c1 = arith.constant 1 : index
    %c0_2 = arith.constant 0 : index
    %c0_3 = arith.constant 0 : index
    %3 = vector.load %arg1[%c1, %c0_2, %c0_3] : memref<4x8x64xf32, #tpu.memory_space<vmem>>, vector<1x8x64xf32>
    %4 = vector.shape_cast %3 : vector<1x8x64xf32> to vector<8x64xf32>
    %5 = arith.addf %1, %4 : vector<8x64xf32>
    %6 = arith.mulf %4, %4 : vector<8x64xf32>
    %7 = arith.addf %2, %6 : vector<8x64xf32>
    %c2 = arith.constant 2 : index
    %c0_4 = arith.constant 0 : index
    %c0_5 = arith.constant 0 : index
    %8 = vector.load %arg1[%c2, %c0_4, %c0_5] : memref<4x8x64xf32, #tpu.memory_space<vmem>>, vector<1x8x64xf32>
    %9 = vector.shape_cast %8 : vector<1x8x64xf32> to vector<8x64xf32>
    %10 = arith.addf %5, %9 : vector<8x64xf32>
    %11 = arith.mulf %9, %9 : vector<8x64xf32>
    %12 = arith.addf %7, %11 : vector<8x64xf32>
    %c3 = arith.constant 3 : index
    %c0_6 = arith.constant 0 : index
    %c0_7 = arith.constant 0 : index
    %13 = vector.load %arg1[%c3, %c0_6, %c0_7] : memref<4x8x64xf32, #tpu.memory_space<vmem>>, vector<1x8x64xf32>
    %14 = vector.shape_cast %13 : vector<1x8x64xf32> to vector<8x64xf32>
    %15 = arith.addf %10, %14 : vector<8x64xf32>
    %16 = arith.mulf %14, %14 : vector<8x64xf32>
    %17 = arith.addf %12, %16 : vector<8x64xf32>
    %cst = arith.constant 2.500000e-01 : f32
    %18 = vector.broadcast %cst : f32 to vector<8x64xf32>
    %19 = arith.mulf %15, %18 : vector<8x64xf32>
    %20 = arith.mulf %15, %19 : vector<8x64xf32>
    %21 = arith.subf %17, %20 : vector<8x64xf32>
    %cst_8 = arith.constant 0.333333343 : f32
    %22 = vector.broadcast %cst_8 : f32 to vector<8x64xf32>
    %23 = arith.mulf %21, %22 : vector<8x64xf32>
    %cst_9 = arith.constant 0.000000e+00 : f32
    %24 = vector.broadcast %cst_9 : f32 to vector<8x64xf32>
    %25 = arith.maximumf %23, %24 : vector<8x64xf32>
    %26 = math.sqrt %25 : vector<8x64xf32>
    %c0_10 = arith.constant 0 : index
    %c0_11 = arith.constant 0 : index
    %27 = vector.load %arg2[%c0_10, %c0_11] : memref<8x64xf32, #tpu.memory_space<vmem>>, vector<8x64xf32>
    tpu.vector_store %arg2[%c0_10, %c0_11], %26 {strides = array<i32>} : memref<8x64xf32, #tpu.memory_space<vmem>>, vector<8x64xf32>,
    return
  }
  func.func @transform_0(%arg0: i32) -> (i32, i32, i32) {
    %c0_i32 = arith.constant 0 : i32
    %c0_i32_0 = arith.constant 0 : i32
    %c0_i32_1 = arith.constant 0 : i32
    return %c0_i32, %arg0, %c0_i32_0 : i32, i32, i32
  }
  func.func @transform_1(%arg0: i32) -> (i32, i32) {
    %c0_i32 = arith.constant 0 : i32
    %c0_i32_0 = arith.constant 0 : i32
    return %arg0, %c0_i32 : i32, i32
  }
}

</mosaic_0001>

<bundles_post_ra>
// kernel: tpu_custom_call.1
= control target key start
LH: loop header
LB: loop body
LE: loop exit
PB: predicated region body
PF: predicated region fallthrough
CT: control target
= control target key end

     0   :  { %6 = vsyncpa [#allocation3], 0  ;;  %s156_s0 = inlined_call_operand.hbm [shape: f32[4,8,64], index: 0, kind: input, shape index: {}]   ;;  %s157_s1 = inlined_call_operand.hbm [shape: f32[8,64], index: 1, kind: output, shape index: {}]  }
   0x1   :  { %7 = vsyncpa [#allocation4], 0  ;;  %s12_s8 = sshll.u32 %s156_s0, 4  ;;  %s136_s9 = smov [#allocation2]   ;;  %s13_s8 = int_to_ptr.hbm [resolvable:$true] %s12_s8 }
   0x2   :  { %s14_s10 = sshll.u32 %s136_s9, 4  ;;  %s137_s11 = smov 128   ;;  %s15_s10 = int_to_ptr.vmem [resolvable:$true] %s14_s10 }
   0x3   :  { %s138_s12 = smov 8  }
   0x4   :  { %20 = dma.hbm_to_vmem [thread:$0]  %s13_s8, 512, %s15_s10, [#allocation3], %s137_s11, %s137_s11, %s138_s12  }
   0x5   :  { %132 = dma.done.wait [#allocation3], 512  }
   0x6   :  { %133 = vsyncadd [#allocation3], 4294966784  ;;  %v25_v0 = vld [vmem:[#allocation2] sm:$0xff]  ;;  %v28_v1 = vld [vmem:[#allocation2 + $0x8] sm:$0xff]  ;;  %s139_s0 = smov [#allocation5]   ;;  %s68_s16 = sshll.u32 %s157_s1, 4  ;;  %s69_s16 = int_to_ptr.hbm [resolvable:$true] %s68_s16 }
   0x7   :  { %v33_v2 = vld [vmem:[#allocation2 + $0x10] sm:$0xff]  ;;  %v26_v3 = vmul.f32 %v25_v0, %v25_v0  ;;  %v29_v4 = vadd.f32 %v28_v1, %v25_v0  ;;  %v30_v5 = vmul.f32 %v28_v1, %v28_v1  ;;  %v38_v7 = vld [vmem:[#allocation2 + $0x18] sm:$0xff]  ;;  %s66_s13 = sshll.u32 %s139_s0, 4  ;;  %vm59_vm2 = vcmask 523264   ;;  %s67_s13 = int_to_ptr.vmem [resolvable:$true] %s66_s13 }
   0x8   :  { %v35_v6 = vmul.f32 %v33_v2, %v33_v2  ;;  %v40_v10 = vmul.f32 %v38_v7, %v38_v7 }
   0x9   :  { %v31_v8 = vadd.f32 %v30_v5, %v26_v3  ;;  %v34_v9 = vadd.f32 %v33_v2, %v29_v4 }
   0xb   :  { %v36_v11 = vadd.f32 %v35_v6, %v31_v8  ;;  %v39_v12 = vadd.f32 %v38_v7, %v34_v9 }
   0xd   :  { %v41_v13 = vadd.f32 %v40_v10, %v36_v11  ;;  %v42_v14 = vmul.f32 0.25, %v39_v12 }
   0xf   :  { %v43_v15 = vmul.f32 %v42_v14, %v39_v12 }
  0x11   :  { %v44_v16 = vsub.f32 %v41_v13, %v43_v15 }
  0x13   :  { %v45_v17 = vmul.f32 0.33333334, %v44_v16 }
  0x15   :  { %v46_v18 = vmax.f32 %v45_v17, 0.0 }
  0x17   :  { %82 = vrsqrt.f32 %v46_v18  ;;  %vm54_vm0 = vcmp.eq.f32.partialorder %v46_v18, inf  ;;  %v57_v25 = vand.u32 2147483648, %v46_v18  ;;  %vm56_vm1 = vcmp.eq.f32.partialorder %v46_v18, 0.0 }
  0x1d   :  { %v83_v19 = vpop.eup %82 }
  0x1e   :  { %v48_v20 = vmul.f32 %v83_v19, %v46_v18 }
  0x20   :  { %v49_v21 = vmul.f32 %v83_v19, %v48_v20 }
  0x22   :  { %v50_v22 = vmul.f32 0.5, %v49_v21 }
  0x24   :  { %v51_v23 = vsub.f32 1.5, %v50_v22 }
  0x26   :  { %v52_v24 = vmul.f32 %v83_v19, %v51_v23 }
  0x28   :  { %v53_v26 = vmul.f32 %v52_v24, %v46_v18 }
  0x2a   :  { %v55_v27 = vsel %vm54_vm0, %v46_v18, %v53_v26 }
  0x2b   :  { %v58_v28 = vsel %vm56_vm1, %v57_v25, %v55_v27 }
  0x2c   :  { %60 = vst.msk [vmem:[#allocation5] sm:$0xff] %vm59_vm2, %v58_v28 }
  0x2d   :  { %71 = dma.vmem_to_hbm [thread:$0]  %s67_s13, 128, %s69_s16, [#allocation4]  }
  0x2e   :  { %134 = dma.done.wait [#allocation4], 128  }
  0x2f   :  { %135 = vsyncadd [#allocation4], 4294967168 }
  0x30   :  { %76 = vsyncpa [#allocation3], 1 }
  0x31   :  { %77 = vsyncpa [#allocation4], 1 }

</bundles_post_ra>
